<compile_context>
chip_gen: v6e
topology: v6e:2x2x1
jax: 0.10.0
libtpu: 0.0.40
codegen_flags: <defaults>
</compile_context>

<pallas_src>
import functools

import jax
import jax.numpy as jnp
from jax import lax
from jax.experimental import pallas as pl
from jax.experimental.pallas import tpu as pltpu


def _round_up(a, m):
    return ((a + m - 1) // m) * m


# ----------------------------------------------------------------------------
# Path 1: table resident in VMEM -> one-hot MXU gather + fused projection
# ----------------------------------------------------------------------------
def _glove_resident_kernel(idx_ref, table_ref, w_ref, b_ref, out_ref):
    ids = idx_ref[...]                                     # (tm, 1) int32
    tm = ids.shape[0]
    V = table_ref.shape[0]
    # One-hot row gather on the MXU (an out-of-range id would give a zero row).
    onehot = (ids == lax.broadcasted_iota(jnp.int32, (tm, V), 1)).astype(
        table_ref.dtype)
    emb = jnp.dot(onehot, table_ref[...], preferred_element_type=jnp.float32)
    out = jnp.dot(emb.astype(w_ref.dtype), w_ref[...],
                  preferred_element_type=jnp.float32)
    out_ref[...] = (out + b_ref[...].astype(jnp.float32)).astype(out_ref.dtype)


# ----------------------------------------------------------------------------
# Path 2: HBM table -> double-buffered per-row DMA gather + fused projection
# ----------------------------------------------------------------------------
def _glove_dma_kernel(idx_ref, table_ref, w_ref, b_ref, out_ref,
                      emb_buf, sems, *, tm):
    i = pl.program_id(0)
    n = pl.num_programs(0)
    slot = lax.rem(i, 2)

    def issue_tile(tile_idx, slot_idx):
        base = tile_idx * tm

        @pl.loop(0, tm)
        def _(j):
            tok = idx_ref[base + j]                      # SMEM scalar read
            pltpu.make_async_copy(
                table_ref.at[pl.ds(tok, 1), :],          # one HBM table row
                emb_buf.at[slot_idx, pl.ds(j, 1), :],    # row j of slot's tile
                sems.at[slot_idx],
            ).start()

    # Prime slot 0 with tile 0 on the very first grid step.
    @pl.when(i == 0)
    def _():
        issue_tile(0, 0)

    # Prefetch tile i+1 into the other slot BEFORE waiting on this slot
    # (keeps the SMEM id reads / DMA starts ahead of the wait).
    @pl.when(i + 1 < n)
    def _():
        issue_tile(i + 1, 1 - slot)

    # Wait for the tm row gathers of the current slot.  A DMA wait only needs
    # the semaphore plus the copy's byte count, so each wait descriptor uses a
    # same-shaped (1, glove_dim) row; tm waits exactly cover the tm starts.
    @pl.loop(0, tm)
    def _(j):
        pltpu.make_async_copy(
            table_ref.at[pl.ds(0, 1), :],
            emb_buf.at[slot, pl.ds(j, 1), :],
            sems.at[slot],
        ).wait()

    emb = emb_buf[slot]                                   # (tm, glove_dim)
    out = jnp.dot(emb.astype(w_ref.dtype), w_ref[...],
                  preferred_element_type=jnp.float32)
    out_ref[...] = (out + b_ref[...].astype(jnp.float32)).astype(out_ref.dtype)


# ----------------------------------------------------------------------------
# Wrapper
# ----------------------------------------------------------------------------
def glove_embedding(x, table, w, b, *, tm=None, force_path=None):
    """Pallas forward of Glove_embedding.

    x:     (B, T) token ids (any real dtype; cast like `.to(torch.long)`).
    table: (V, glove_dim) GloVe table (f32 or bf16).
    w:     (glove_dim, d_model) projection weight (transposed nn.Linear weight).
    b:     (d_model,) projection bias.
    Returns (B, T, d_model) float32.
    """
    B = x.shape[0]
    ids = x.reshape(-1).astype(jnp.int32)          # x.to(torch.long).flatten()
    M = ids.shape[0]
    V, glove_dim = table.shape
    d_model = w.shape[1]

    # Clamp ids so a bad float->int cast can never become an OOB gather.
    ids = jnp.clip(ids, 0, V - 1)

    # Row tile: big enough to fill the MXU M dimension and amortize the
    # ~0.35 us per-step overhead, never larger than the (padded) token count.
    if tm is None:
        tm = 256
    tm = max(8, _round_up(min(tm, max(M, 1)), 8))
    Mp = _round_up(M, tm)
    if Mp != M:
        ids = jnp.pad(ids, (0, Mp - M))            # pad with (valid) token 0
    grid = (Mp // tm,)

    b2 = b.reshape(1, d_model)
    table_bytes = V * glove_dim * jnp.dtype(table.dtype).itemsize

    # VMEM-resident-table threshold: leave room for weight / output / gather
    # buffers.  v7x has only 64 MiB per TensorCore vs 128 MiB on v5e/v6e.
    try:
        vmem_cap = int(pltpu.get_tpu_info().vmem_capacity_bytes)
    except Exception:
        vmem_cap = 64 * 1024 * 1024
    resident_budget = vmem_cap // 4

    if force_path is None:
        use_resident = table_bytes <= resident_budget
    else:
        use_resident = (force_path == "resident")

    # Raise the scoped-VMEM limit only when needed (v5e default is 16 MiB).
    est_bytes = (2 * tm * glove_dim * 4 + 2 * tm * d_model * 4
                 + glove_dim * d_model * 4 + 4 * d_model
                 + (table_bytes if use_resident else 0))
    vmem_limit = None
    if est_bytes > 12 * 1024 * 1024:
        vmem_limit = min(int(est_bytes * 2), vmem_cap - 8 * 1024 * 1024)

    if use_resident:
        ids2 = ids.reshape(Mp, 1)
        out = pl.pallas_call(
            _glove_resident_kernel,
            out_shape=jax.ShapeDtypeStruct((Mp, d_model), jnp.float32),
            grid_spec=pltpu.PrefetchScalarGridSpec(
                num_scalar_prefetch=0,
                grid=grid,
                in_specs=[
                    pl.BlockSpec((tm, 1), lambda i: (i, 0)),               # ids
                    pl.BlockSpec((V, glove_dim), lambda i: (0, 0)),        # table (resident)
                    pl.BlockSpec((glove_dim, d_model), lambda i: (0, 0)),  # w (resident)
                    pl.BlockSpec((1, d_model), lambda i: (0, 0)),          # b (resident)
                ],
                out_specs=pl.BlockSpec((tm, d_model), lambda i: (i, 0)),
            ),
            compiler_params=pltpu.CompilerParams(
                dimension_semantics=("parallel",),
                vmem_limit_bytes=vmem_limit,
            ),
        )(ids2, table, w, b2)
    else:
        out = pl.pallas_call(
            functools.partial(_glove_dma_kernel, tm=tm),
            out_shape=jax.ShapeDtypeStruct((Mp, d_model), jnp.float32),
            grid_spec=pltpu.PrefetchScalarGridSpec(
                num_scalar_prefetch=1,                      # token ids -> SMEM
                grid=grid,
                in_specs=[
                    pl.BlockSpec(memory_space=pl.ANY),                          # table in HBM
                    pl.BlockSpec((glove_dim, d_model), lambda i, idx: (0, 0)),  # w (resident)
                    pl.BlockSpec((1, d_model), lambda i, idx: (0, 0)),          # b (resident)
                ],
                out_specs=pl.BlockSpec((tm, d_model), lambda i, idx: (i, 0)),
                scratch_shapes=[
                    pltpu.VMEM((2, tm, glove_dim), table.dtype),  # double-buffered gather tile
                    pltpu.SemaphoreType.DMA((2,)),                # one shared sem per slot
                ],
            ),
            compiler_params=pltpu.CompilerParams(
                # Cross-step scratch carry (tile i+1 prefetched at step i)
                # requires sequential execution of the grid on one core.
                dimension_semantics=("arbitrary",),
                vmem_limit_bytes=vmem_limit,
            ),
        )(ids, table, w, b2)

    return out[:M].reshape(B, -1, d_model)


# ----------------------------------------------------------------------------
# Pure-JAX reference (same math, used only for the correctness check)
# ----------------------------------------------------------------------------
def _ref_glove_embedding(x, table, w, b):
    B = x.shape[0]
    ids = x.reshape(-1).astype(jnp.int32)
    emb = jnp.take(table, ids, axis=0).reshape(B, -1, table.shape[1])
    return jnp.dot(emb, w, preferred_element_type=jnp.float32) + b


if __name__ == "__main__":
    # Small shapes consistent with the module: B=2 sequences of T=16 tokens,
    # vocab V=512, glove_dim=256, d_model=128 (lane-dense output).
    B, T, V, GLOVE_DIM, D_MODEL = 2, 16, 512, 256, 128

    key = jax.random.PRNGKey(0)
    k_ids, k_tbl, k_w, k_b = jax.random.split(key, 4)

    # TODO(synk): the real model loads the GloVe table from disk
    # (opt.glove_embedding_dict); here it is built in-script.
    table = jax.random.normal(k_tbl, (V, GLOVE_DIM), jnp.float32)
    w = 0.1 * jax.random.normal(k_w, (GLOVE_DIM, D_MODEL), jnp.float32)
    b = 0.01 * jax.random.normal(k_b, (D_MODEL,), jnp.float32)

    # Token ids arrive as a float tensor in the original forward; the cast to
    # integer happens inside the wrapper (mirrors x.to(torch.long)).
    ids = jax.random.randint(k_ids, (B, T), 0, V, jnp.int32)
    x = ids.astype(jnp.float32)

    ref = _ref_glove_embedding(x, table, w, b)

    # Path 1: VMEM-resident table (auto-selected for this 512 KiB table).
    out_res = jax.block_until_ready(glove_embedding(x, table, w, b))
    assert out_res.shape == (B, T, D_MODEL)
    assert jnp.allclose(out_res, ref, rtol=5e-2, atol=5e-2), "resident path mismatch"

    # Path 2: HBM gather with double-buffered per-row DMAs.  Forced here with a
    # small row tile so the grid has several steps and the cross-step prefetch
    # / slot ping-pong is actually exercised.
    out_dma = jax.block_until_ready(
        glove_embedding(x, table, w, b, tm=8, force_path="hbm"))
    assert out_dma.shape == (B, T, D_MODEL)
    assert jnp.allclose(out_dma, ref, rtol=5e-2, atol=5e-2), "hbm path mismatch"

    print("KERNEL_OK")
</pallas_src>

<mosaic_0001>
module attributes {stable_mosaic.version = 11 : i64} {
  func.func @_glove_resident_kernel(%arg0: i32, %arg1: memref<32x1xi32, #tpu.memory_space<vmem>>, %arg2: memref<512x256xf32, #tpu.memory_space<vmem>>, %arg3: memref<256x128xf32, #tpu.memory_space<vmem>>, %arg4: memref<1x128xf32, #tpu.memory_space<vmem>>, %arg5: memref<32x128xf32, #tpu.memory_space<vmem>>) attributes {dimension_semantics = [#tpu.dimension_semantics<parallel>], iteration_bounds = array<i64: 1>, scalar_prefetch = 0 : i64, scratch_operands = 0 : i64, tpu.core_type = #tpu.core_type<tc>, window_params = [{transform_indices = @transform_0, window_bounds = array<i64: 32, 1>}, {pipeline_mode = #tpu.pipeline_mode<synchronous>, transform_indices = @transform_1, window_bounds = array<i64: 512, 256>}, {pipeline_mode = #tpu.pipeline_mode<synchronous>, transform_indices = @transform_2, window_bounds = array<i64: 256, 128>}, {pipeline_mode = #tpu.pipeline_mode<synchronous>, transform_indices = @transform_3, window_bounds = array<i64: 1, 128>}, {transform_indices = @transform_4, window_bounds = array<i64: 32, 128>}]} {
    %c0 = arith.constant 0 : index
    %c0_0 = arith.constant 0 : index
    %0 = vector.load %arg1[%c0, %c0_0] : memref<32x1xi32, #tpu.memory_space<vmem>>, vector<32x1xi32>
    %1 = tpu.iota {dimensions = array<i32: 1>} : vector<32x512xi32>
    %2 = vector.broadcast %0 : vector<32x1xi32> to vector<32x512xi32>
    %3 = arith.cmpi eq, %2, %1 : vector<32x512xi32>
    %4 = arith.extui %3 : vector<32x512xi1> to vector<32x512xi32>
    %5 = arith.sitofp %4 : vector<32x512xi32> to vector<32x512xf32>
    %c0_1 = arith.constant 0 : index
    %c0_2 = arith.constant 0 : index
    %6 = vector.load %arg2[%c0_1, %c0_2] : memref<512x256xf32, #tpu.memory_space<vmem>>, vector<512x256xf32>
    %cst = arith.constant dense<0.000000e+00> : vector<32x256xf32>
    %7 = tpu.matmul %5, %6, %cst {dimension_numbers = #tpu.dot_dimension_numbers<[1], [0], [0], [1], [0, 0, 1, 1], [], []>} : vector<32x512xf32>, vector<512x256xf32>, vector<32x256xf32> -> vector<32x256xf32>
    %c0_3 = arith.constant 0 : index
    %c0_4 = arith.constant 0 : index
    %8 = vector.load %arg3[%c0_3, %c0_4] : memref<256x128xf32, #tpu.memory_space<vmem>>, vector<256x128xf32>
    %cst_5 = arith.constant dense<0.000000e+00> : vector<32x128xf32>
    %9 = tpu.matmul %7, %8, %cst_5 {dimension_numbers = #tpu.dot_dimension_numbers<[1], [0], [0], [1], [0, 0, 1, 1], [], []>} : vector<32x256xf32>, vector<256x128xf32>, vector<32x128xf32> -> vector<32x128xf32>
    %c0_6 = arith.constant 0 : index
    %c0_7 = arith.constant 0 : index
    %10 = vector.load %arg4[%c0_6, %c0_7] : memref<1x128xf32, #tpu.memory_space<vmem>>, vector<1x128xf32>
    %11 = vector.broadcast %10 : vector<1x128xf32> to vector<32x128xf32>
    %12 = arith.addf %9, %11 : vector<32x128xf32>
    %c0_8 = arith.constant 0 : index
    %c0_9 = arith.constant 0 : index
    %13 = vector.load %arg5[%c0_8, %c0_9] : memref<32x128xf32, #tpu.memory_space<vmem>>, vector<32x128xf32>
    tpu.vector_store %arg5[%c0_8, %c0_9], %12 {strides = array<i32>} : memref<32x128xf32, #tpu.memory_space<vmem>>, vector<32x128xf32>,
    return
  }
  func.func @transform_0(%arg0: i32) -> (i32, i32) {
    %c0_i32 = arith.constant 0 : i32
    %c0_i32_0 = arith.constant 0 : i32
    return %arg0, %c0_i32 : i32, i32
  }
  func.func @transform_1(%arg0: i32) -> (i32, i32) {
    %c0_i32 = arith.constant 0 : i32
    %c0_i32_0 = arith.constant 0 : i32
    %c0_i32_1 = arith.constant 0 : i32
    return %c0_i32, %c0_i32_0 : i32, i32
  }
  func.func @transform_2(%arg0: i32) -> (i32, i32) {
    %c0_i32 = arith.constant 0 : i32
    %c0_i32_0 = arith.constant 0 : i32
    %c0_i32_1 = arith.constant 0 : i32
    return %c0_i32, %c0_i32_0 : i32, i32
  }
  func.func @transform_3(%arg0: i32) -> (i32, i32) {
    %c0_i32 = arith.constant 0 : i32
    %c0_i32_0 = arith.constant 0 : i32
    %c0_i32_1 = arith.constant 0 : i32
    return %c0_i32, %c0_i32_0 : i32, i32
  }
  func.func @transform_4(%arg0: i32) -> (i32, i32) {
    %c0_i32 = arith.constant 0 : i32
    %c0_i32_0 = arith.constant 0 : i32
    return %arg0, %c0_i32 : i32, i32
  }
}

</mosaic_0001>

<bundles_post_ra>
// kernel: tpu_custom_call.1
= control target key start
LH: loop header
LB: loop body
LE: loop exit
PB: predicated region body
PF: predicated region fallthrough
CT: control target
= control target key end

     0   :  { %9 = vsyncpa [#allocation3], 0  ;;  %s819_s0 = inlined_call_operand.vmem [shape: s32[32,1], index: 0, kind: input, shape index: {}]   ;;  %s820_s1 = inlined_call_operand.hbm [shape: f32[512,256], index: 1, kind: input, shape index: {}]   ;;  %s821_s2 = inlined_call_operand.hbm [shape: f32[256,128], index: 2, kind: input, shape index: {}]   ;;  %s822_s3 = inlined_call_operand.vmem [shape: f32[1,128], index: 3, kind: input, shape index: {}]   ;;  %s823_s4 = inlined_call_operand.hbm [shape: f32[32,128], index: 4, kind: output, shape index: {}]  }
   0x1   :  { %10 = vsyncpa [#allocation6], 0 }
   0x2   :  { %11 = vsyncpa [#allocation4], 0  ;;  %s753_s15 = smov [#allocation2]  }
   0x3   :  { %s19_s16 = sshll.u32 %s753_s15, 4  ;;  %s20_s16 = int_to_ptr.vmem [resolvable:$true] %s19_s16 }
   0x4   :  { %s695_s17 = scalar_lea.vmem %s20_s16, 16384  ;;  %p700_p1 = scmp.lt.s32.totalorder %s20_s16, %s20_s16 }
   0x5   :  { %p696_p0 = scmp.ne.s32.totalorder %s20_s16, %s695_s17  ;;  %p701_p2 = scmp.lt.s32.totalorder %s695_s17, %s695_s17 }
   0x7   :  { %p702_p3 = por %p701_p2, %p700_p1 }
   0x9   :  { %p703_p4 = pnand %p702_p3, %p696_p0 }
   0xb   :  { %706 = shalt.err (!%p703_p4)
}
   0xc   :  { %s754_s18 = smov 256   ;;  %s755_s19 = smov 16  }
   0xd   :  { %25 = dma.hbm_to_vmem [thread:$0]  %s820_s1, 16384, %s20_s16, [#allocation3], %s754_s18, %s754_s18, %s755_s19  }
   0xe   :  { %s756_s22 = smov [#allocation5]  }
   0xf   :  { %s31_s23 = sshll.u32 %s756_s22, 4  ;;  %s32_s23 = int_to_ptr.vmem [resolvable:$true] %s31_s23 }
  0x10   :  { %s715_s24 = scalar_lea.vmem %s32_s23, 4096  ;;  %p720_p6 = scmp.lt.s32.totalorder %s32_s23, %s32_s23 }
  0x11   :  { %p716_p5 = scmp.ne.s32.totalorder %s32_s23, %s715_s24  ;;  %p721_p7 = scmp.lt.s32.totalorder %s715_s24, %s715_s24 }
  0x13   :  { %p722_p8 = por %p721_p7, %p720_p6 }
  0x15   :  { %p723_p9 = pnand %p722_p8, %p716_p5 }
  0x17   :  { %726 = shalt.err (!%p723_p9)
}
  0x18   :  { %s757_s25 = smov 128   ;;  %s758_s26 = smov 8  }
  0x19   :  { %37 = dma.hbm_to_vmem [thread:$0]  %s821_s2, 4096, %s32_s23, [#allocation6], %s757_s25, %s757_s25, %s758_s26  }
  0x1a   :  { %747 = dma.done.wait [#allocation3], 16384  }
  0x1b   :  { %748 = vsyncadd [#allocation3], 4294950912 }
  0x1c   :  { %749 = dma.done.wait [#allocation6], 4096  }
  0x1d   :  { %750 = vsyncadd [#allocation6], 4294963200  ;;  %v759_v0 = vmov 0   ;;  %v46_v1 = vld [vmem:[%s819_s0] sm:$0xff]  ;;  %v48_v2 = vld [vmem:[%s819_s0 + $0x10] sm:$0xff]  ;;  %s761_s10 = smov [#allocation7]  }
  0x1e   :  { %685 = vset.pattern.permute.xlu0 %v759_v0  ;;  %686 = vset.pattern.permute.xlu1 %v759_v0  ;;  %v47_v3 = vld [vmem:[%s819_s0 + $0x8] sm:$0xff]  ;;  %v49_v4 = vld [vmem:[%s819_s0 + $0x18] sm:$0xff]  ;;  %v145_v7 = vld [vmem:[#allocation2 + $0xf0] sm:$0xff]  ;;  %s554_s11 = sshll.u32 %s761_s10, 4  ;;  %s555_s11 = int_to_ptr.vmem [resolvable:$true] %s554_s11 }
  0x1f   :  { %56 = vperm.xlu0 %685, %v46_v1   ;;  %62 = vperm.xlu1 %686, %v48_v2   ;;  %v146_v5 = vld [vmem:[#allocation2 + $0xf8] sm:$0xff]  ;;  %v209_v8 = vld [vmem:[#allocation2 + $0x2f0] sm:$0xff]  ;;  %v144_v9 = vld [vmem:[#allocation2 + $0xe8] sm:$0xff]  ;;  %p732_p11 = scmp.lt.s32.totalorder %s555_s11, %s555_s11 }
  0x20   :  { %v210_v6 = vld [vmem:[#allocation2 + $0x2f8] sm:$0xff]  ;;  %243 = vmatprep.subr.mxu0 %v146_v5  ;;  %v208_v10 = vld [vmem:[#allocation2 + $0x2e8] sm:$0xff]  ;;  %v143_v11 = vld [vmem:[#allocation2 + $0xe0] sm:$0xff] }
  0x21   :  { %332 = vmatprep.subr.mxu1 %v210_v6  ;;  %244 = vmatpush1.msra.mxu0 %v145_v7  ;;  %v207_v12 = vld [vmem:[#allocation2 + $0x2e0] sm:$0xff]  ;;  %v142_v13 = vld [vmem:[#allocation2 + $0xd8] sm:$0xff]  ;;  %v141_v15 = vld [vmem:[#allocation2 + $0xd0] sm:$0xff] }
  0x22   :  { %333 = vmatpush1.msra.mxu1 %v209_v8  ;;  %245 = vmatprep.subr.mxu0 %v144_v9  ;;  %v206_v14 = vld [vmem:[#allocation2 + $0x2d8] sm:$0xff]  ;;  %v205_v16 = vld [vmem:[#allocation2 + $0x2d0] sm:$0xff]  ;;  %v140_v17 = vld [vmem:[#allocation2 + $0xc8] sm:$0xff] }
  0x23   :  { %334 = vmatprep.subr.mxu1 %v208_v10  ;;  %59 = vperm.xlu0 %685, %v47_v3   ;;  %v204_v18 = vld [vmem:[#allocation2 + $0x2c8] sm:$0xff]  ;;  %v139_v19 = vld [vmem:[#allocation2 + $0xc0] sm:$0xff]  ;;  %v138_v21 = vld [vmem:[#allocation2 + $0xb8] sm:$0xff] }
  0x24   :  { %65 = vperm.xlu1 %686, %v49_v4   ;;  %246 = vmatpush1.msra.mxu0 %v143_v11  ;;  %v203_v20 = vld [vmem:[#allocation2 + $0x2c0] sm:$0xff]  ;;  %v202_v22 = vld [vmem:[#allocation2 + $0x2b8] sm:$0xff]  ;;  %v137_v23 = vld [vmem:[#allocation2 + $0xb0] sm:$0xff] }
  0x25   :  { %335 = vmatpush1.msra.mxu1 %v207_v12  ;;  %247 = vmatprep.subr.mxu0 %v142_v13  ;;  %v201_v24 = vld [vmem:[#allocation2 + $0x2b0] sm:$0xff]  ;;  %v136_v25 = vld [vmem:[#allocation2 + $0xa8] sm:$0xff]  ;;  %v135_v27 = vld [vmem:[#allocation2 + $0xa0] sm:$0xff] }
  0x26   :  { %336 = vmatprep.subr.mxu1 %v206_v14  ;;  %248 = vmatpush1.msra.mxu0 %v141_v15  ;;  %v200_v26 = vld [vmem:[#allocation2 + $0x2a8] sm:$0xff]  ;;  %v199_v28 = vld [vmem:[#allocation2 + $0x2a0] sm:$0xff]  ;;  %v134_v29 = vld [vmem:[#allocation2 + $0x98] sm:$0xff] }
  0x27   :  { %337 = vmatpush1.msra.mxu1 %v205_v16  ;;  %249 = vmatprep.subr.mxu0 %v140_v17  ;;  %v198_v30 = vld [vmem:[#allocation2 + $0x298] sm:$0xff]  ;;  %v133_v31 = vld [vmem:[#allocation2 + $0x90] sm:$0xff]  ;;  %v132_v33 = vld [vmem:[#allocation2 + $0x88] sm:$0xff] }
  0x28   :  { %338 = vmatprep.subr.mxu1 %v204_v18  ;;  %250 = vmatpush1.msra.mxu0 %v139_v19  ;;  %v197_v32 = vld [vmem:[#allocation2 + $0x290] sm:$0xff]  ;;  %v196_v34 = vld [vmem:[#allocation2 + $0x288] sm:$0xff]  ;;  %v131_v35 = vld [vmem:[#allocation2 + $0x80] sm:$0xff] }
  0x29   :  { %339 = vmatpush1.msra.mxu1 %v203_v20  ;;  %251 = vmatprep.subr.mxu0 %v138_v21  ;;  %v195_v36 = vld [vmem:[#allocation2 + $0x280] sm:$0xff]  ;;  %v130_v37 = vld [vmem:[#allocation2 + $0x78] sm:$0xff]  ;;  %v129_v39 = vld [vmem:[#allocation2 + $0x70] sm:$0xff] }
  0x2a   :  { %340 = vmatprep.subr.mxu1 %v202_v22  ;;  %252 = vmatpush1.msra.mxu0 %v137_v23  ;;  %v194_v38 = vld [vmem:[#allocation2 + $0x278] sm:$0xff]  ;;  %v193_v40 = vld [vmem:[#allocation2 + $0x270] sm:$0xff]  ;;  %v128_v41 = vld [vmem:[#allocation2 + $0x68] sm:$0xff] }
  0x2b   :  { %341 = vmatpush1.msra.mxu1 %v201_v24  ;;  %253 = vmatprep.subr.mxu0 %v136_v25  ;;  %v192_v42 = vld [vmem:[#allocation2 + $0x268] sm:$0xff]  ;;  %v127_v43 = vld [vmem:[#allocation2 + $0x60] sm:$0xff]  ;;  %v126_v45 = vld [vmem:[#allocation2 + $0x58] sm:$0xff] }
  0x2c   :  { %342 = vmatprep.subr.mxu1 %v200_v26  ;;  %254 = vmatpush1.msra.mxu0 %v135_v27  ;;  %v191_v44 = vld [vmem:[#allocation2 + $0x260] sm:$0xff]  ;;  %v190_v46 = vld [vmem:[#allocation2 + $0x258] sm:$0xff]  ;;  %v125_v47 = vld [vmem:[#allocation2 + $0x50] sm:$0xff] }
  0x2d   :  { %343 = vmatpush1.msra.mxu1 %v199_v28  ;;  %255 = vmatprep.subr.mxu0 %v134_v29  ;;  %v189_v48 = vld [vmem:[#allocation2 + $0x250] sm:$0xff]  ;;  %v124_v49 = vld [vmem:[#allocation2 + $0x48] sm:$0xff]  ;;  %v123_v51 = vld [vmem:[#allocation2 + $0x40] sm:$0xff] }
  0x2e   :  { %344 = vmatprep.subr.mxu1 %v198_v30  ;;  %256 = vmatpush1.msra.mxu0 %v133_v31  ;;  %v188_v50 = vld [vmem:[#allocation2 + $0x248] sm:$0xff]  ;;  %v187_v52 = vld [vmem:[#allocation2 + $0x240] sm:$0xff]  ;;  %v122_v53 = vld [vmem:[#allocation2 + $0x38] sm:$0xff] }
  0x2f   :  { %345 = vmatpush1.msra.mxu1 %v197_v32  ;;  %257 = vmatprep.subr.mxu0 %v132_v33  ;;  %v186_v54 = vld [vmem:[#allocation2 + $0x238] sm:$0xff]  ;;  %v121_v55 = vld [vmem:[#allocation2 + $0x30] sm:$0xff]  ;;  %v120_v57 = vld [vmem:[#allocation2 + $0x28] sm:$0xff] }
  0x30   :  { %346 = vmatprep.subr.mxu1 %v196_v34  ;;  %258 = vmatpush1.msra.mxu0 %v131_v35  ;;  %v185_v56 = vld [vmem:[#allocation2 + $0x230] sm:$0xff]  ;;  %v184_v58 = vld [vmem:[#allocation2 + $0x228] sm:$0xff]  ;;  %v119_v59 = vld [vmem:[#allocation2 + $0x20] sm:$0xff] }
  0x31   :  { %347 = vmatpush1.msra.mxu1 %v195_v36  ;;  %259 = vmatprep.subr.mxu0 %v130_v37  ;;  %v183_v60 = vld [vmem:[#allocation2 + $0x220] sm:$0xff]  ;;  %v118_v61 = vld [vmem:[#allocation2 + $0x18] sm:$0xff]  ;;  %v117_v63 = vld [vmem:[#allocation2 + $0x10] sm:$0xff] }
  0x32   :  { %348 = vmatprep.subr.mxu1 %v194_v38  ;;  %260 = vmatpush1.msra.mxu0 %v129_v39  ;;  %v182_v62 = vld [vmem:[#allocation2 + $0x218] sm:$0xff]  ;;  %v181_v0 = vld [vmem:[#allocation2 + $0x210] sm:$0xff]  ;;  %v116_v1 = vld [vmem:[#allocation2 + $0x8] sm:$0xff] }
  0x33   :  { %349 = vmatpush1.msra.mxu1 %v193_v40  ;;  %261 = vmatprep.subr.mxu0 %v128_v41  ;;  %v180_v2 = vld [vmem:[#allocation2 + $0x208] sm:$0xff]  ;;  %v115_v3 = vld [vmem:[#allocation2] sm:$0xff]  ;;  %v178_v5 = vld [vmem:[#allocation2 + $0x1f8] sm:$0xff] }
  0x34   :  { %350 = vmatprep.subr.mxu1 %v192_v42  ;;  %262 = vmatpush1.msra.mxu0 %v127_v43  ;;  %v179_v4 = vld [vmem:[#allocation2 + $0x200] sm:$0xff]  ;;  %v242_v6 = vld [vmem:[#allocation2 + $0x3f8] sm:$0xff]  ;;  %v177_v7 = vld [vmem:[#allocation2 + $0x1f0] sm:$0xff] }
  0x35   :  { %351 = vmatpush1.msra.mxu1 %v191_v44  ;;  %263 = vmatprep.subr.mxu0 %v126_v45  ;;  %v241_v8 = vld [vmem:[#allocation2 + $0x3f0] sm:$0xff]  ;;  %v176_v9 = vld [vmem:[#allocation2 + $0x1e8] sm:$0xff]  ;;  %v175_v11 = vld [vmem:[#allocation2 + $0x1e0] sm:$0xff] }
  0x36   :  { %352 = vmatprep.subr.mxu1 %v190_v46  ;;  %264 = vmatpush1.msra.mxu0 %v125_v47  ;;  %v240_v10 = vld [vmem:[#allocation2 + $0x3e8] sm:$0xff]  ;;  %v239_v12 = vld [vmem:[#allocation2 + $0x3e0] sm:$0xff]  ;;  %v174_v13 = vld [vmem:[#allocation2 + $0x1d8] sm:$0xff] }
  0x37   :  { %353 = vmatpush1.msra.mxu1 %v189_v48  ;;  %265 = vmatprep.subr.mxu0 %v124_v49  ;;  %v238_v14 = vld [vmem:[#allocation2 + $0x3d8] sm:$0xff]  ;;  %v173_v15 = vld [vmem:[#allocation2 + $0x1d0] sm:$0xff]  ;;  %v172_v17 = vld [vmem:[#allocation2 + $0x1c8] sm:$0xff] }
  0x38   :  { %354 = vmatprep.subr.mxu1 %v188_v50  ;;  %266 = vmatpush1.msra.mxu0 %v123_v51  ;;  %v237_v16 = vld [vmem:[#allocation2 + $0x3d0] sm:$0xff]  ;;  %v236_v18 = vld [vmem:[#allocation2 + $0x3c8] sm:$0xff]  ;;  %v171_v19 = vld [vmem:[#allocation2 + $0x1c0] sm:$0xff] }
  0x39   :  { %355 = vmatpush1.msra.mxu1 %v187_v52  ;;  %267 = vmatprep.subr.mxu0 %v122_v53  ;;  %v235_v20 = vld [vmem:[#allocation2 + $0x3c0] sm:$0xff]  ;;  %v170_v21 = vld [vmem:[#allocation2 + $0x1b8] sm:$0xff]  ;;  %v169_v23 = vld [vmem:[#allocation2 + $0x1b0] sm:$0xff] }
  0x3a   :  { %356 = vmatprep.subr.mxu1 %v186_v54  ;;  %268 = vmatpush1.msra.mxu0 %v121_v55  ;;  %v234_v22 = vld [vmem:[#allocation2 + $0x3b8] sm:$0xff]  ;;  %v233_v24 = vld [vmem:[#allocation2 + $0x3b0] sm:$0xff]  ;;  %v168_v25 = vld [vmem:[#allocation2 + $0x1a8] sm:$0xff] }
  0x3b   :  { %357 = vmatpush1.msra.mxu1 %v185_v56  ;;  %269 = vmatprep.subr.mxu0 %v120_v57  ;;  %v232_v26 = vld [vmem:[#allocation2 + $0x3a8] sm:$0xff]  ;;  %v167_v27 = vld [vmem:[#allocation2 + $0x1a0] sm:$0xff]  ;;  %v166_v29 = vld [vmem:[#allocation2 + $0x198] sm:$0xff] }
  0x3c   :  { %358 = vmatprep.subr.mxu1 %v184_v58  ;;  %270 = vmatpush1.msra.mxu0 %v119_v59  ;;  %v231_v28 = vld [vmem:[#allocation2 + $0x3a0] sm:$0xff]  ;;  %v230_v30 = vld [vmem:[#allocation2 + $0x398] sm:$0xff]  ;;  %v165_v31 = vld [vmem:[#allocation2 + $0x190] sm:$0xff] }
  0x3d   :  { %359 = vmatpush1.msra.mxu1 %v183_v60  ;;  %271 = vmatprep.subr.mxu0 %v118_v61  ;;  %v229_v32 = vld [vmem:[#allocation2 + $0x390] sm:$0xff]  ;;  %v164_v33 = vld [vmem:[#allocation2 + $0x188] sm:$0xff]  ;;  %v163_v35 = vld [vmem:[#allocation2 + $0x180] sm:$0xff] }
  0x3e   :  { %360 = vmatprep.subr.mxu1 %v182_v62  ;;  %272 = vmatpush1.msra.mxu0 %v117_v63  ;;  %v228_v34 = vld [vmem:[#allocation2 + $0x388] sm:$0xff]  ;;  %v227_v36 = vld [vmem:[#allocation2 + $0x380] sm:$0xff]  ;;  %v162_v37 = vld [vmem:[#allocation2 + $0x178] sm:$0xff] }
  0x3f   :  { %361 = vmatpush1.msra.mxu1 %v181_v0  ;;  %273 = vmatprep.subr.mxu0 %v116_v1  ;;  %v226_v38 = vld [vmem:[#allocation2 + $0x378] sm:$0xff]  ;;  %v161_v39 = vld [vmem:[#allocation2 + $0x170] sm:$0xff]  ;;  %v160_v41 = vld [vmem:[#allocation2 + $0x168] sm:$0xff] }
  0x40   :  { %362 = vmatprep.subr.mxu1 %v180_v2  ;;  %274 = vmatpush1.msra.mxu0 %v115_v3  ;;  %v225_v40 = vld [vmem:[#allocation2 + $0x370] sm:$0xff]  ;;  %v224_v42 = vld [vmem:[#allocation2 + $0x368] sm:$0xff]  ;;  %v159_v43 = vld [vmem:[#allocation2 + $0x160] sm:$0xff] }
  0x41   :  { %363 = vmatpush1.msra.mxu1 %v179_v4  ;;  %275 = vmatprep.subr.mxu0 %v178_v5  ;;  %v223_v44 = vld [vmem:[#allocation2 + $0x360] sm:$0xff]  ;;  %v158_v45 = vld [vmem:[#allocation2 + $0x158] sm:$0xff]  ;;  %v157_v47 = vld [vmem:[#allocation2 + $0x150] sm:$0xff] }
  0x42   :  { %364 = vmatprep.subr.mxu1 %v242_v6  ;;  %276 = vmatpush2.msra.mxu0 %v177_v7  ;;  %v222_v46 = vld [vmem:[#allocation2 + $0x358] sm:$0xff]  ;;  %v221_v48 = vld [vmem:[#allocation2 + $0x350] sm:$0xff]  ;;  %v156_v49 = vld [vmem:[#allocation2 + $0x148] sm:$0xff]  ;;  %v50_v6 = vlaneseq }
  0x43   :  { %365 = vmatpush2.msra.mxu1 %v241_v8  ;;  %277 = vmatprep.subr.mxu0 %v176_v9  ;;  %v220_v50 = vld [vmem:[#allocation2 + $0x348] sm:$0xff]  ;;  %v155_v51 = vld [vmem:[#allocation2 + $0x140] sm:$0xff]  ;;  %v154_v53 = vld [vmem:[#allocation2 + $0x138] sm:$0xff] }
  0x44   :  { %366 = vmatprep.subr.mxu1 %v240_v10  ;;  %278 = vmatpush2.msra.mxu0 %v175_v11  ;;  %v219_v52 = vld [vmem:[#allocation2 + $0x340] sm:$0xff]  ;;  %v218_v54 = vld [vmem:[#allocation2 + $0x338] sm:$0xff]  ;;  %v153_v55 = vld [vmem:[#allocation2 + $0x130] sm:$0xff]  ;;  %v51_v7 = vand.u32 127, %v50_v6 }
  0x45   :  { %367 = vmatpush2.msra.mxu1 %v239_v12  ;;  %279 = vmatprep.subr.mxu0 %v174_v13  ;;  %v217_v56 = vld [vmem:[#allocation2 + $0x330] sm:$0xff]  ;;  %v152_v57 = vld [vmem:[#allocation2 + $0x128] sm:$0xff]  ;;  %v151_v59 = vld [vmem:[#allocation2 + $0x120] sm:$0xff]  ;;  %v760_v13 = vmov 1.0  }
  0x46   :  { %368 = vmatprep.subr.mxu1 %v238_v14  ;;  %280 = vmatpush2.msra.mxu0 %v173_v15  ;;  %v216_v58 = vld [vmem:[#allocation2 + $0x328] sm:$0xff]  ;;  %v215_v60 = vld [vmem:[#allocation2 + $0x320] sm:$0xff]  ;;  %v150_v61 = vld [vmem:[#allocation2 + $0x118] sm:$0xff]  ;;  %v52_v8 = vadd.s32 128, %v51_v7  ;;  %v54_v9 = vadd.s32 384, %v51_v7  ;;  %v53_v10 = vadd.s32 256, %v51_v7 }
  0x47   :  { %369 = vmatpush2.msra.mxu1 %v237_v16  ;;  %281 = vmatprep.subr.mxu0 %v172_v17  ;;  %v214_v62 = vld [vmem:[#allocation2 + $0x318] sm:$0xff]  ;;  %v149_v63 = vld [vmem:[#allocation2 + $0x110] sm:$0xff]  ;;  %v148_v1 = vld [vmem:[#allocation2 + $0x108] sm:$0xff] }
  0x48   :  { %370 = vmatprep.subr.mxu1 %v236_v18  ;;  %282 = vmatpush2.msra.mxu0 %v171_v19  ;;  %v213_v0 = vld [vmem:[#allocation2 + $0x310] sm:$0xff]  ;;  %v212_v2 = vld [vmem:[#allocation2 + $0x308] sm:$0xff]  ;;  %v147_v3 = vld [vmem:[#allocation2 + $0x100] sm:$0xff] }
  0x49   :  { %371 = vmatpush2.msra.mxu1 %v235_v20  ;;  %283 = vmatprep.subr.mxu0 %v170_v21  ;;  %v211_v4 = vld [vmem:[#allocation2 + $0x300] sm:$0xff]  ;;  %v452_v5 = vld [vmem:[#allocation5 + $0xf8] sm:$0xff]  ;;  %v451_v15 = vld [vmem:[#allocation5 + $0xf0] sm:$0xff] }
  0x4a   :  { %372 = vmatprep.subr.mxu1 %v234_v22  ;;  %284 = vmatpush2.msra.mxu0 %v169_v23  ;;  %v436_v12 = vld [vmem:[#allocation5 + $0x78] sm:$0xff]  ;;  %v435_v17 = vld [vmem:[#allocation5 + $0x70] sm:$0xff]  ;;  %v450_v18 = vld [vmem:[#allocation5 + $0xe8] sm:$0xff] }
  0x4b   :  { %373 = vmatpush2.msra.mxu1 %v233_v24  ;;  %285 = vmatprep.subr.mxu0 %v168_v25  ;;  %v434_v20 = vld [vmem:[#allocation5 + $0x68] sm:$0xff]  ;;  %v449_v21 = vld [vmem:[#allocation5 + $0xe0] sm:$0xff]  ;;  %v448_v23 = vld [vmem:[#allocation5 + $0xd8] sm:$0xff] }
  0x4c   :  { %374 = vmatprep.subr.mxu1 %v232_v26  ;;  %286 = vmatpush2.msra.mxu0 %v167_v27  ;;  %v433_v22 = vld [vmem:[#allocation5 + $0x60] sm:$0xff]  ;;  %v432_v24 = vld [vmem:[#allocation5 + $0x58] sm:$0xff]  ;;  %v447_v25 = vld [vmem:[#allocation5 + $0xd0] sm:$0xff] }
  0x4d   :  { %375 = vmatpush2.msra.mxu1 %v231_v28  ;;  %287 = vmatprep.subr.mxu0 %v166_v29  ;;  %v431_v26 = vld [vmem:[#allocation5 + $0x50] sm:$0xff]  ;;  %v446_v27 = vld [vmem:[#allocation5 + $0xc8] sm:$0xff]  ;;  %v445_v29 = vld [vmem:[#allocation5 + $0xc0] sm:$0xff] }
  0x4e   :  { %376 = vmatprep.subr.mxu1 %v230_v30  ;;  %288 = vmatpush2.msra.mxu0 %v165_v31  ;;  %v430_v28 = vld [vmem:[#allocation5 + $0x48] sm:$0xff]  ;;  %v429_v30 = vld [vmem:[#allocation5 + $0x40] sm:$0xff]  ;;  %v444_v31 = vld [vmem:[#allocation5 + $0xb8] sm:$0xff] }
  0x4f   :  { %377 = vmatpush2.msra.mxu1 %v229_v32  ;;  %289 = vmatprep.subr.mxu0 %v164_v33  ;;  %v428_v32 = vld [vmem:[#allocation5 + $0x38] sm:$0xff]  ;;  %v443_v33 = vld [vmem:[#allocation5 + $0xb0] sm:$0xff] }
  0x50   :  { %378 = vmatprep.subr.mxu1 %v228_v34  ;;  %290 = vmatpush2.msra.mxu0 %v163_v35  ;;  %v427_v34 = vld [vmem:[#allocation5 + $0x30] sm:$0xff]  ;;  %v442_v35 = vld [vmem:[#allocation5 + $0xa8] sm:$0xff] }
  0x51   :  { %379 = vmatpush2.msra.mxu1 %v227_v36  ;;  %291 = vmatprep.subr.mxu0 %v162_v37  ;;  %v426_v36 = vld [vmem:[#allocation5 + $0x28] sm:$0xff]  ;;  %v441_v37 = vld [vmem:[#allocation5 + $0xa0] sm:$0xff] }
  0x52   :  { %380 = vmatprep.subr.mxu1 %v226_v38  ;;  %292 = vmatpush2.msra.mxu0 %v161_v39  ;;  %v425_v38 = vld [vmem:[#allocation5 + $0x20] sm:$0xff]  ;;  %v440_v39 = vld [vmem:[#allocation5 + $0x98] sm:$0xff] }
  0x53   :  { %381 = vmatpush2.msra.mxu1 %v225_v40  ;;  %293 = vmatprep.subr.mxu0 %v160_v41  ;;  %v424_v40 = vld [vmem:[#allocation5 + $0x18] sm:$0xff]  ;;  %v439_v41 = vld [vmem:[#allocation5 + $0x90] sm:$0xff] }
  0x54   :  { %382 = vmatprep.subr.mxu1 %v224_v42  ;;  %294 = vmatpush2.msra.mxu0 %v159_v43  ;;  %v423_v42 = vld [vmem:[#allocation5 + $0x10] sm:$0xff]  ;;  %v438_v43 = vld [vmem:[#allocation5 + $0x88] sm:$0xff] }
  0x55   :  { %383 = vmatpush2.msra.mxu1 %v223_v44  ;;  %295 = vmatprep.subr.mxu0 %v158_v45  ;;  %v422_v44 = vld [vmem:[#allocation5 + $0x8] sm:$0xff]  ;;  %v437_v45 = vld [vmem:[#allocation5 + $0x80] sm:$0xff] }
  0x56   :  { %384 = vmatprep.subr.mxu1 %v222_v46  ;;  %296 = vmatpush2.msra.mxu0 %v157_v47  ;;  %v421_v46 = vld [vmem:[#allocation5] sm:$0xff] }
  0x57   :  { %385 = vmatpush2.msra.mxu1 %v221_v48  ;;  %297 = vmatprep.subr.mxu0 %v156_v49 }
  0x58   :  { %386 = vmatprep.subr.mxu1 %v220_v50  ;;  %298 = vmatpush2.msra.mxu0 %v155_v51 }
  0x59   :  { %387 = vmatpush2.msra.mxu1 %v219_v52  ;;  %299 = vmatprep.subr.mxu0 %v154_v53 }
  0x5a   :  { %388 = vmatprep.subr.mxu1 %v218_v54  ;;  %300 = vmatpush2.msra.mxu0 %v153_v55 }
  0x5b   :  { %389 = vmatpush2.msra.mxu1 %v217_v56  ;;  %301 = vmatprep.subr.mxu0 %v152_v57 }
  0x5c   :  { %390 = vmatprep.subr.mxu1 %v216_v58  ;;  %302 = vmatpush2.msra.mxu0 %v151_v59 }
  0x5d   :  { %391 = vmatpush2.msra.mxu1 %v215_v60  ;;  %303 = vmatprep.subr.mxu0 %v150_v61 }
  0x5e   :  { %392 = vmatprep.subr.mxu1 %v214_v62  ;;  %304 = vmatpush2.msra.mxu0 %v149_v63 }
  0x5f   :  { %393 = vmatpush2.msra.mxu1 %v213_v0  ;;  %305 = vmatprep.subr.mxu0 %v148_v1 }
  0x60   :  { %394 = vmatprep.subr.mxu1 %v212_v2  ;;  %306 = vmatpush2.msra.mxu0 %v147_v3 }
  0x61   :  { %395 = vmatpush2.msra.mxu1 %v211_v4  ;;  %600 = vmatprep.subr.mxu0 %v452_v5 }
  0x62   :  { %644 = vmatprep.subr.mxu1 %v452_v5 }
  0x9a   :  { %v57_v11 = vpop.permute.xlu0 %56  ;;  %v63_v14 = vpop.permute.xlu1 %62 }
  0x9b   :  { %vm68_vm0 = vcmp.eq.s32.totalorder %v57_v11, %v52_v8  ;;  %vm70_vm1 = vcmp.eq.s32.totalorder %v57_v11, %v54_v9  ;;  %vm67_vm2 = vcmp.eq.s32.totalorder %v57_v11, %v51_v7  ;;  %vm69_vm3 = vcmp.eq.s32.totalorder %v57_v11, %v53_v10 }
  0x9c   :  { %583 = vmatprep.mubr.msk.f32.mxu0 %vm68_vm0, %v760_v13  ;;  %591 = vmatprep.mubr.msk.f32.mxu1 %vm70_vm1, %v760_v13  ;;  %vm76_vm4 = vcmp.eq.s32.totalorder %v63_v14, %v52_v8  ;;  %vm78_vm5 = vcmp.eq.s32.totalorder %v63_v14, %v54_v9  ;;  %vm75_vm10 = vcmp.eq.s32.totalorder %v63_v14, %v51_v7 }
  0x9d   :  { %584 = vmatmul.mubr.msk.f32.vlgmr.msra.gmra.mxu0 %vm67_vm2, %v760_v13  ;;  %592 = vmatmul.mubr.msk.f32.vlgmr.msra.gmra.mxu1 %vm69_vm3, %v760_v13  ;;  %vm77_vm11 = vcmp.eq.s32.totalorder %v63_v14, %v53_v10 }
  0x9e   :  { %v60_v16 = vpop.permute.xlu0 %59  ;;  %601 = vmatpush3.msra.mxu0 %v436_v12  ;;  %660 = vmatpush3.msra.mxu1 %v436_v12 }
  0x9f   :  { %vm72_vm6 = vcmp.eq.s32.totalorder %v60_v16, %v52_v8  ;;  %vm74_vm7 = vcmp.eq.s32.totalorder %v60_v16, %v54_v9  ;;  %vm71_vm8 = vcmp.eq.s32.totalorder %v60_v16, %v51_v7  ;;  %vm73_vm9 = vcmp.eq.s32.totalorder %v60_v16, %v53_v10  ;;  %602 = vmatprep.subr.mxu0 %v451_v15  ;;  %v66_v19 = vpop.permute.xlu1 %65 }
  0xa0   :  { %585 = vmatprep.mubr.msk.f32.mxu0 %vm72_vm6, %v760_v13  ;;  %593 = vmatprep.mubr.msk.f32.mxu1 %vm74_vm7, %v760_v13  ;;  %vm80_vm12 = vcmp.eq.s32.totalorder %v66_v19, %v52_v8  ;;  %vm82_vm13 = vcmp.eq.s32.totalorder %v66_v19, %v54_v9  ;;  %vm79_vm14 = vcmp.eq.s32.totalorder %v66_v19, %v51_v7  ;;  %v599_v8 = vld [vmem:[%s822_s3] ss:$0 sm:$0xff]  ;;  %s727_s3 = scalar_lea.vmem %s555_s11, 512 }
  0xa1   :  { %586 = vmatmul.mubr.msk.f32.gmra.mxu0 %vm71_vm8, %v760_v13  ;;  %594 = vmatmul.mubr.msk.f32.gmra.mxu1 %vm73_vm9, %v760_v13  ;;  %vm81_vm15 = vcmp.eq.s32.totalorder %v66_v19, %v53_v10  ;;  %p728_p10 = scmp.ne.s32.totalorder %s555_s11, %s727_s3  ;;  %p733_p12 = scmp.lt.s32.totalorder %s727_s3, %s727_s3 }
  0xa2   :  { %587 = vmatprep.mubr.msk.f32.mxu0 %vm76_vm4, %v760_v13  ;;  %595 = vmatprep.mubr.msk.f32.mxu1 %vm78_vm5, %v760_v13 }
  0xa3   :  { %603 = vmatpush3.msra.mxu0 %v435_v17  ;;  %645 = vmatprep.subr.mxu1 %v451_v15  ;;  %p734_p13 = por %p733_p12, %p732_p11 }
  0xa4   :  { %604 = vmatprep.subr.mxu0 %v450_v18  ;;  %661 = vmatpush3.msra.mxu1 %v435_v17 }
  0xa5   :  { %588 = vmatmul.mubr.msk.f32.gmra.mxu0 %vm75_vm10, %v760_v13  ;;  %596 = vmatmul.mubr.msk.f32.gmra.mxu1 %vm77_vm11, %v760_v13  ;;  %p735_p0 = pnand %p734_p13, %p728_p10 }
  0xa6   :  { %589 = vmatprep.mubr.msk.f32.mxu0 %vm80_vm12, %v760_v13  ;;  %597 = vmatprep.mubr.msk.f32.mxu1 %vm82_vm13, %v760_v13 }
  0xa7   :  { %605 = vmatpush3.msra.mxu0 %v434_v20  ;;  %646 = vmatprep.subr.mxu1 %v450_v18 }
  0xa8   :  { %606 = vmatprep.subr.mxu0 %v449_v21  ;;  %662 = vmatpush3.msra.mxu1 %v434_v20 }
  0xa9   :  { %590 = vmatmul.mubr.msk.f32.gmra.mxu0 %vm79_vm14, %v760_v13  ;;  %598 = vmatmul.mubr.msk.f32.gmra.mxu1 %vm81_vm15, %v760_v13 }
  0xaa   :  { %607 = vmatpush3.msra.mxu0 %v433_v22  ;;  %647 = vmatprep.subr.mxu1 %v449_v21 }
  0xab   :  { %608 = vmatprep.subr.mxu0 %v448_v23  ;;  %663 = vmatpush3.msra.mxu1 %v433_v22 }
  0xac   :  { %609 = vmatpush3.msra.mxu0 %v432_v24  ;;  %648 = vmatprep.subr.mxu1 %v448_v23 }
  0xad   :  { %610 = vmatprep.subr.mxu0 %v447_v25  ;;  %664 = vmatpush3.msra.mxu1 %v432_v24 }
  0xae   :  { %611 = vmatpush3.msra.mxu0 %v431_v26  ;;  %649 = vmatprep.subr.mxu1 %v447_v25 }
  0xaf   :  { %612 = vmatprep.subr.mxu0 %v446_v27  ;;  %665 = vmatpush3.msra.mxu1 %v431_v26 }
  0xb0   :  { %613 = vmatpush3.msra.mxu0 %v430_v28  ;;  %650 = vmatprep.subr.mxu1 %v446_v27 }
  0xb1   :  { %614 = vmatprep.subr.mxu0 %v445_v29  ;;  %666 = vmatpush3.msra.mxu1 %v430_v28 }
  0xb2   :  { %615 = vmatpush3.msra.mxu0 %v429_v30  ;;  %651 = vmatprep.subr.mxu1 %v445_v29 }
  0xb3   :  { %616 = vmatprep.subr.mxu0 %v444_v31  ;;  %667 = vmatpush3.msra.mxu1 %v429_v30 }
  0xb4   :  { %617 = vmatpush3.msra.mxu0 %v428_v32  ;;  %652 = vmatprep.subr.mxu1 %v444_v31 }
  0xb5   :  { %618 = vmatprep.subr.mxu0 %v443_v33  ;;  %668 = vmatpush3.msra.mxu1 %v428_v32 }
  0xb6   :  { %619 = vmatpush3.msra.mxu0 %v427_v34  ;;  %653 = vmatprep.subr.mxu1 %v443_v33 }
  0xb7   :  { %620 = vmatprep.subr.mxu0 %v442_v35  ;;  %669 = vmatpush3.msra.mxu1 %v427_v34 }
  0xb8   :  { %621 = vmatpush3.msra.mxu0 %v426_v36  ;;  %654 = vmatprep.subr.mxu1 %v442_v35 }
  0xb9   :  { %622 = vmatprep.subr.mxu0 %v441_v37  ;;  %670 = vmatpush3.msra.mxu1 %v426_v36 }
  0xba   :  { %623 = vmatpush3.msra.mxu0 %v425_v38  ;;  %655 = vmatprep.subr.mxu1 %v441_v37 }
  0xbb   :  { %624 = vmatprep.subr.mxu0 %v440_v39  ;;  %671 = vmatpush3.msra.mxu1 %v425_v38 }
  0xbc   :  { %625 = vmatpush3.msra.mxu0 %v424_v40  ;;  %656 = vmatprep.subr.mxu1 %v440_v39 }
  0xbd   :  { %672 = vmatpush3.msra.mxu1 %v424_v40  ;;  %626 = vmatprep.subr.mxu0 %v439_v41 }
  0xbe   :  { %657 = vmatprep.subr.mxu1 %v439_v41  ;;  %627 = vmatpush3.msra.mxu0 %v423_v42 }
  0xbf   :  { %673 = vmatpush3.msra.mxu1 %v423_v42  ;;  %628 = vmatprep.subr.mxu0 %v438_v43 }
  0xc0   :  { %658 = vmatprep.subr.mxu1 %v438_v43  ;;  %629 = vmatpush3.msra.mxu0 %v422_v44 }
  0xc1   :  { %674 = vmatpush3.msra.mxu1 %v422_v44  ;;  %630 = vmatprep.subr.mxu0 %v437_v45 }
  0xc2   :  { %659 = vmatprep.subr.mxu1 %v437_v45  ;;  %631 = vmatpush3.msra.mxu0 %v421_v46 }
  0xc3   :  { %675 = vmatpush3.msra.mxu1 %v421_v46 }
 0x15d   :  { %v309_v47 = vpop.f32.mrf.mxu0  ;;  %v398_v48 = vpop.f32.mrf.mxu1 }
 0x15e   :  { %v399_v52 = vadd.f32 %v398_v48, %v309_v47 }
 0x15f   :  { %v311_v49 = vpop.f32.mrf.mxu0  ;;  %v400_v50 = vpop.f32.mrf.mxu1 }
 0x160   :  { %v401_v51 = vadd.f32 %v400_v50, %v311_v49 }
 0x161   :  { %v315_v53 = vpop.f32.mrf.mxu0  ;;  %v404_v54 = vpop.f32.mrf.mxu1 }
 0x162   :  { %524 = vmatprep.mubr.f32.mxu0 %v401_v51  ;;  %v405_v58 = vadd.f32 %v404_v54, %v315_v53 }
 0x163   :  { %v317_v55 = vpop.f32.mrf.mxu0  ;;  %v406_v56 = vpop.f32.mrf.mxu1  ;;  %525 = vmatmul.mubr.f32.vlgmr.msra.gmra.mxu0 %v399_v52 }
 0x164   :  { %v407_v57 = vadd.f32 %v406_v56, %v317_v55 }
 0x165   :  { %v321_v59 = vpop.f32.mrf.mxu0  ;;  %v410_v60 = vpop.f32.mrf.mxu1 }
 0x166   :  { %529 = vmatprep.mubr.f32.mxu0 %v407_v57  ;;  %v411_v0 = vadd.f32 %v410_v60, %v321_v59 }
 0x167   :  { %v323_v61 = vpop.f32.mrf.mxu0  ;;  %v412_v62 = vpop.f32.mrf.mxu1  ;;  %530 = vmatmul.mubr.f32.gmra.mxu0 %v405_v58 }
 0x168   :  { %v413_v63 = vadd.f32 %v412_v62, %v323_v61 }
 0x169   :  { %v327_v1 = vpop.f32.mrf.mxu0  ;;  %v416_v2 = vpop.f32.mrf.mxu1 }
 0x16a   :  { %534 = vmatprep.mubr.f32.mxu1 %v413_v63  ;;  %v417_v6 = vadd.f32 %v416_v2, %v327_v1 }
 0x16b   :  { %v329_v3 = vpop.f32.mrf.mxu0  ;;  %v418_v4 = vpop.f32.mrf.mxu1  ;;  %535 = vmatmul.mubr.f32.vlgmr.msra.gmra.mxu1 %v411_v0 }
 0x16c   :  { %v419_v5 = vadd.f32 %v418_v4, %v329_v3 }
 0x16e   :  { %539 = vmatprep.mubr.f32.mxu1 %v419_v5 }
 0x16f   :  { %540 = vmatmul.mubr.f32.gmra.mxu1 %v417_v6 }
 0x223   :  { %v632_v7 = vpop.f32.mrf.mxu0 }
 0x225   :  { %v633_v9 = vpop.f32.mrf.mxu0 }
 0x226   :  { %v634_v10 = vadd.f32 %v633_v9, %v632_v7 }
 0x227   :  { %v635_v11 = vpop.f32.mrf.mxu0 }
 0x228   :  { %v527_v12 = vadd.f32 %v634_v10, %v599_v8 }
 0x229   :  { %v636_v13 = vpop.f32.mrf.mxu0 }
 0x22a   :  { %545 = vst [vmem:[#allocation7] sm:$0xff] %v527_v12  ;;  %v637_v14 = vadd.f32 %v636_v13, %v635_v11 }
 0x22b   :  { %v638_v15 = vpop.f32.mrf.mxu1 }
 0x22c   :  { %v532_v16 = vadd.f32 %v637_v14, %v599_v8 }
 0x22d   :  { %v639_v17 = vpop.f32.mrf.mxu1 }
 0x22e   :  { %546 = vst [vmem:[#allocation7 + $0x8] sm:$0xff] %v532_v16  ;;  %v640_v18 = vadd.f32 %v639_v17, %v638_v15 }
 0x22f   :  { %v641_v19 = vpop.f32.mrf.mxu1 }
 0x230   :  { %v537_v20 = vadd.f32 %v640_v18, %v599_v8 }
 0x231   :  { %v642_v21 = vpop.f32.mrf.mxu1 }
 0x232   :  { %547 = vst [vmem:[#allocation7 + $0x10] sm:$0xff] %v537_v20  ;;  %v643_v22 = vadd.f32 %v642_v21, %v641_v19 }
 0x234   :  { %v542_v23 = vadd.f32 %v643_v22, %v599_v8 }
 0x236   :  { %548 = vst [vmem:[#allocation7 + $0x18] sm:$0xff] %v542_v23 }
 0x237   :  { %738 = shalt.err (!%p735_p0)
}
 0x238   :  { %560 = dma.vmem_to_hbm [thread:$0]  %s555_s11, 512, %s823_s4, [#allocation4], %s757_s25, %s757_s25, %s758_s26  }
 0x239   :  { %751 = dma.done.wait [#allocation4], 512  }
 0x23a   :  { %752 = vsyncadd [#allocation4], 4294966784 }
 0x23b   :  { %564 = vsyncpa [#allocation3], 1 }
 0x23c   :  { %565 = vsyncpa [#allocation6], 1 }
 0x23d   :  { %566 = vsyncpa [#allocation4], 1 }

</bundles_post_ra>
